<compile_context>
chip_gen: v6e
topology: v6e:2x2x1
jax: 0.10.0
libtpu: 0.0.40
codegen_flags: <defaults>
</compile_context>

<pallas_src>
import math

import jax
import jax.numpy as jnp
from jax.experimental import pallas as pl
from jax.experimental.pallas import tpu as pltpu


def _round_up(x, m):
    return ((x + m - 1) // m) * m


# ------------------------------ kernel -------------------------------

def _pointer_kernel(xd_ref, xe_ref, mask_ref, w_ref, out_ref):
    bt, t_pad, h = xd_ref.shape
    s_pad = xe_ref.shape[1]
    neg_inf = jnp.float32(-jnp.inf)

    # packed weights: rows [0:H)=w1, [H:2H)=w2, [2H]=v   (all stored as (in, out))
    w1 = w_ref[0:h, :]                       # (H, H)
    w2 = w_ref[h:2 * h, :]                   # (H, H)
    v_row = w_ref[2 * h:2 * h + 1, :]        # (1, H)

    # flattened token-wise projections -> two MXU matmuls for the whole batch block
    enc = jnp.dot(xe_ref[...].reshape(bt * s_pad, h), w1,
                  preferred_element_type=jnp.float32).reshape(bt, s_pad, h)
    dec = jnp.dot(xd_ref[...].reshape(bt * t_pad, h), w2,
                  preferred_element_type=jnp.float32).reshape(bt, t_pad, h)

    # pointer scores, batch-vectorized:  (Bt, T, S, H) tanh -> reduce over H (lane axis)
    th = jnp.tanh(enc[:, None, :, :] + dec[:, :, None, :])
    prod = jnp.sum(th * v_row[None, None, :, :], axis=-1)        # (Bt, T, S)

    # mask padded / user-masked keys (mask broadcast over T), then log_softmax over S
    prod = jnp.where(mask_ref[...] > 0.5, neg_inf, prod)
    mx = jnp.max(prod, axis=-1, keepdims=True)
    sh = prod - mx
    out_ref[...] = sh - jnp.log(jnp.sum(jnp.exp(sh), axis=-1, keepdims=True))


# ------------------------------ wrapper -------------------------------

def _pick_block_b(B, T_pad, S_pad, H, *, requested, budget_bytes=12 * 1024 * 1024):
    """Cap the batch block so the dominant (Bt,T,S,H) f32 intermediate stays in VMEM."""
    per_b = max(T_pad * S_pad * max(H, 128) * 4, 1)   # lane-padded estimate
    cap = max(1, budget_bytes // per_b)
    return max(1, min(requested, B, cap))


def pointer_network_forward(x_decoder, x_encoder, mask, w1_t, w2_t, v_row, *, block_b=16):
    """x_decoder:(B,T,H) f32, x_encoder:(B,S,H) f32, mask:(B,S) bool (True = masked key).
    w1_t/w2_t:(H,H) = torch weight.T (in,out); v_row:(1,H) = torch v.weight."""
    B, T, H = x_decoder.shape
    S = x_encoder.shape[1]
    assert x_encoder.shape == (B, S, H) and mask.shape == (B, S)

    T_pad = _round_up(T, 8)
    S_pad = _round_up(S, 8)
    bt = _pick_block_b(B, T_pad, S_pad, H, requested=block_b)
    B_pad = _round_up(B, bt)

    # pad to sublane-aligned shapes; padded key columns are masked, padded batch/decoder
    # rows produce finite junk that is stripped below (never all-masked -> no NaNs).
    xd = jnp.zeros((B_pad, T_pad, H), jnp.float32)
    xd = xd.at[:B, :T, :].set(x_decoder.astype(jnp.float32))
    xe = jnp.zeros((B_pad, S_pad, H), jnp.float32)
    xe = xe.at[:B, :S, :].set(x_encoder.astype(jnp.float32))
    mk = jnp.zeros((B_pad, 1, S_pad), jnp.float32)
    mk = mk.at[:, :, S:].set(1.0)
    mk = mk.at[:B, 0, :S].set(mask.astype(jnp.float32))

    # pack the three weights into a single slab (one DMA stream)
    W = jnp.concatenate([w1_t.astype(jnp.float32),
                         w2_t.astype(jnp.float32),
                         v_row.astype(jnp.float32)], axis=0)      # (2H+1, H)

    nb = B_pad // bt
    out = pl.pallas_call(
        _pointer_kernel,
        out_shape=jax.ShapeDtypeStruct((B_pad, T_pad, S_pad), jnp.float32),
        grid_spec=pltpu.PrefetchScalarGridSpec(
            num_scalar_prefetch=0,
            grid=(nb,),
            in_specs=[
                pl.BlockSpec((bt, T_pad, H), lambda b: (b, 0, 0)),   # x_decoder block
                pl.BlockSpec((bt, S_pad, H), lambda b: (b, 0, 0)),   # x_encoder block
                pl.BlockSpec((bt, 1, S_pad), lambda b: (b, 0, 0)),   # key-padding mask
                pl.BlockSpec((2 * H + 1, H), lambda b: (0, 0)),      # packed weights
            ],
            out_specs=pl.BlockSpec((bt, T_pad, S_pad), lambda b: (b, 0, 0)),
        ),
        compiler_params=pltpu.CompilerParams(
            dimension_semantics=("parallel",),
            vmem_limit_bytes=64 * 1024 * 1024),
    )(xd, xe, mk, W)
    return out[:B, :T, :S]


# --------------------------- pure-JAX reference ---------------------------

def _reference(x_decoder, x_encoder, mask, w1_t, w2_t, v_row):
    enc = x_encoder @ w1_t                                        # (B, S, H)
    dec = x_decoder @ w2_t                                        # (B, T, H)
    th = jnp.tanh(enc[:, None, :, :] + dec[:, :, None, :])        # (B, T, S, H)
    prod = jnp.einsum('btsh,h->bts', th, v_row[0])
    prod = jnp.where(mask[:, None, :], -jnp.inf, prod)
    return jax.nn.log_softmax(prod, axis=-1)


if __name__ == "__main__":
    B, T, S, H = 4, 6, 10, 64

    key = jax.random.PRNGKey(0)
    k1, k2, k3, k4, k5 = jax.random.split(key, 5)
    x_decoder = jax.random.normal(k1, (B, T, H), jnp.float32)
    x_encoder = jax.random.normal(k2, (B, S, H), jnp.float32)
    src_len = jnp.array([10, 7, 5, 9], jnp.int32)
    mask = jnp.arange(S, dtype=jnp.int32)[None, :] >= src_len[:, None]   # (B, S) bool

    scale = 1.0 / math.sqrt(H)
    w1_t = jax.random.normal(k3, (H, H), jnp.float32) * scale    # torch w1.weight.T
    w2_t = jax.random.normal(k4, (H, H), jnp.float32) * scale    # torch w2.weight.T
    v_row = jax.random.normal(k5, (1, H), jnp.float32) * scale   # torch v.weight (1,H)

    out = pointer_network_forward(x_decoder, x_encoder, mask, w1_t, w2_t, v_row)
    out = jax.block_until_ready(out)
    assert out.shape == (B, T, S)

    ref = _reference(x_decoder, x_encoder, mask, w1_t, w2_t, v_row)
    assert bool(jnp.allclose(out, ref, atol=1e-3, rtol=1e-3)), "kernel != reference"
    print("KERNEL_OK")
</pallas_src>

<mosaic_0001>
module attributes {stable_mosaic.version = 11 : i64} {
  func.func @_pointer_kernel(%arg0: i32, %arg1: memref<4x8x64xf32, #tpu.memory_space<vmem>>, %arg2: memref<4x16x64xf32, #tpu.memory_space<vmem>>, %arg3: memref<4x1x16xf32, #tpu.memory_space<vmem>>, %arg4: memref<129x64xf32, #tpu.memory_space<vmem>>, %arg5: memref<4x8x16xf32, #tpu.memory_space<vmem>>) attributes {dimension_semantics = [#tpu.dimension_semantics<parallel>], iteration_bounds = array<i64: 1>, scalar_prefetch = 0 : i64, scratch_operands = 0 : i64, tpu.core_type = #tpu.core_type<tc>, window_params = [{transform_indices = @transform_0, window_bounds = array<i64: 4, 8, 64>}, {transform_indices = @transform_1, window_bounds = array<i64: 4, 16, 64>}, {transform_indices = @transform_2, window_bounds = array<i64: 4, 1, 16>}, {pipeline_mode = #tpu.pipeline_mode<synchronous>, transform_indices = @transform_3, window_bounds = array<i64: 129, 64>}, {transform_indices = @transform_4, window_bounds = array<i64: 4, 8, 16>}]} {
    %c0 = arith.constant 0 : index
    %c0_0 = arith.constant 0 : index
    %0 = vector.load %arg4[%c0, %c0_0] : memref<129x64xf32, #tpu.memory_space<vmem>>, vector<64x64xf32>
    %c64 = arith.constant 64 : index
    %c0_1 = arith.constant 0 : index
    %1 = vector.load %arg4[%c64, %c0_1] : memref<129x64xf32, #tpu.memory_space<vmem>>, vector<64x64xf32>
    %c128 = arith.constant 128 : index
    %c0_2 = arith.constant 0 : index
    %2 = vector.load %arg4[%c128, %c0_2] : memref<129x64xf32, #tpu.memory_space<vmem>>, vector<1x64xf32>
    %c0_3 = arith.constant 0 : index
    %c0_4 = arith.constant 0 : index
    %c0_5 = arith.constant 0 : index
    %3 = vector.load %arg2[%c0_3, %c0_4, %c0_5] : memref<4x16x64xf32, #tpu.memory_space<vmem>>, vector<4x16x64xf32>
    %4 = vector.shape_cast %3 : vector<4x16x64xf32> to vector<64x64xf32>
    %cst = arith.constant dense<0.000000e+00> : vector<64x64xf32>
    %5 = tpu.matmul %4, %0, %cst {dimension_numbers = #tpu.dot_dimension_numbers<[1], [0], [0], [1], [0, 0, 1, 1], [], []>} : vector<64x64xf32>, vector<64x64xf32>, vector<64x64xf32> -> vector<64x64xf32>
    %6 = vector.shape_cast %5 : vector<64x64xf32> to vector<4x16x64xf32>
    %c0_6 = arith.constant 0 : index
    %c0_7 = arith.constant 0 : index
    %c0_8 = arith.constant 0 : index
    %7 = vector.load %arg1[%c0_6, %c0_7, %c0_8] : memref<4x8x64xf32, #tpu.memory_space<vmem>>, vector<4x8x64xf32>
    %8 = vector.shape_cast %7 : vector<4x8x64xf32> to vector<32x64xf32>
    %cst_9 = arith.constant dense<0.000000e+00> : vector<32x64xf32>
    %9 = tpu.matmul %8, %1, %cst_9 {dimension_numbers = #tpu.dot_dimension_numbers<[1], [0], [0], [1], [0, 0, 1, 1], [], []>} : vector<32x64xf32>, vector<64x64xf32>, vector<32x64xf32> -> vector<32x64xf32>
    %10 = vector.shape_cast %9 : vector<32x64xf32> to vector<4x8x64xf32>
    %11 = vector.shape_cast %6 : vector<4x16x64xf32> to vector<4x1x16x64xf32>
    %12 = vector.shape_cast %10 : vector<4x8x64xf32> to vector<4x8x1x64xf32>
    %13 = vector.broadcast %11 : vector<4x1x16x64xf32> to vector<4x8x16x64xf32>
    %14 = vector.broadcast %12 : vector<4x8x1x64xf32> to vector<4x8x16x64xf32>
    %15 = arith.addf %13, %14 : vector<4x8x16x64xf32>
    %16 = math.tanh %15 : vector<4x8x16x64xf32>
    %17 = vector.shape_cast %2 : vector<1x64xf32> to vector<1x1x1x64xf32>
    %18 = vector.broadcast %17 : vector<1x1x1x64xf32> to vector<4x8x16x64xf32>
    %19 = arith.mulf %16, %18 : vector<4x8x16x64xf32>
    %cst_10 = arith.constant dense<0.000000e+00> : vector<4x8x16xf32>
    %20 = vector.multi_reduction <add>, %19, %cst_10 [3] : vector<4x8x16x64xf32> to vector<4x8x16xf32>
    %c0_11 = arith.constant 0 : index
    %c0_12 = arith.constant 0 : index
    %c0_13 = arith.constant 0 : index
    %21 = vector.load %arg3[%c0_11, %c0_12, %c0_13] : memref<4x1x16xf32, #tpu.memory_space<vmem>>, vector<4x1x16xf32>
    %cst_14 = arith.constant 5.000000e-01 : f32
    %22 = vector.broadcast %cst_14 : f32 to vector<4x1x16xf32>
    %23 = arith.cmpf ogt, %21, %22 : vector<4x1x16xf32>
    %cst_15 = arith.constant 0xFF800000 : f32
    %24 = vector.shape_cast %23 : vector<4x1x16xi1> to vector<4x1x16xi1>
    %25 = vector.broadcast %24 : vector<4x1x16xi1> to vector<4x8x16xi1>
    %26 = vector.broadcast %cst_15 : f32 to vector<4x8x16xf32>
    %27 = arith.select %25, %26, %20 : vector<4x8x16xi1>, vector<4x8x16xf32>
    %cst_16 = arith.constant dense<0xFF800000> : vector<4x8xf32>
    %28 = vector.multi_reduction <maximumf>, %27, %cst_16 [2] : vector<4x8x16xf32> to vector<4x8xf32>
    %29 = vector.shape_cast %28 : vector<4x8xf32> to vector<4x8x1xf32>
    %30 = vector.broadcast %29 : vector<4x8x1xf32> to vector<4x8x16xf32>
    %31 = arith.subf %27, %30 : vector<4x8x16xf32>
    %32 = math.exp %31 : vector<4x8x16xf32>
    %cst_17 = arith.constant dense<0.000000e+00> : vector<4x8xf32>
    %33 = vector.multi_reduction <add>, %32, %cst_17 [2] : vector<4x8x16xf32> to vector<4x8xf32>
    %34 = vector.shape_cast %33 : vector<4x8xf32> to vector<4x8x1xf32>
    %35 = math.log %34 : vector<4x8x1xf32>
    %36 = vector.broadcast %35 : vector<4x8x1xf32> to vector<4x8x16xf32>
    %37 = arith.subf %31, %36 : vector<4x8x16xf32>
    %c0_18 = arith.constant 0 : index
    %c0_19 = arith.constant 0 : index
    %c0_20 = arith.constant 0 : index
    %38 = vector.load %arg5[%c0_18, %c0_19, %c0_20] : memref<4x8x16xf32, #tpu.memory_space<vmem>>, vector<4x8x16xf32>
    tpu.vector_store %arg5[%c0_18, %c0_19, %c0_20], %37 {strides = array<i32>} : memref<4x8x16xf32, #tpu.memory_space<vmem>>, vector<4x8x16xf32>,
    return
  }
  func.func @transform_0(%arg0: i32) -> (i32, i32, i32) {
    %c0_i32 = arith.constant 0 : i32
    %c0_i32_0 = arith.constant 0 : i32
    %c0_i32_1 = arith.constant 0 : i32
    return %arg0, %c0_i32, %c0_i32_0 : i32, i32, i32
  }
  func.func @transform_1(%arg0: i32) -> (i32, i32, i32) {
    %c0_i32 = arith.constant 0 : i32
    %c0_i32_0 = arith.constant 0 : i32
    %c0_i32_1 = arith.constant 0 : i32
    return %arg0, %c0_i32, %c0_i32_0 : i32, i32, i32
  }
  func.func @transform_2(%arg0: i32) -> (i32, i32, i32) {
    %c0_i32 = arith.constant 0 : i32
    %c0_i32_0 = arith.constant 0 : i32
    %c0_i32_1 = arith.constant 0 : i32
    return %arg0, %c0_i32, %c0_i32_0 : i32, i32, i32
  }
  func.func @transform_3(%arg0: i32) -> (i32, i32) {
    %c0_i32 = arith.constant 0 : i32
    %c0_i32_0 = arith.constant 0 : i32
    %c0_i32_1 = arith.constant 0 : i32
    return %c0_i32, %c0_i32_0 : i32, i32
  }
  func.func @transform_4(%arg0: i32) -> (i32, i32, i32) {
    %c0_i32 = arith.constant 0 : i32
    %c0_i32_0 = arith.constant 0 : i32
    %c0_i32_1 = arith.constant 0 : i32
    return %arg0, %c0_i32, %c0_i32_0 : i32, i32, i32
  }
}

</mosaic_0001>

<bundles_post_ra>
// kernel: tpu_custom_call.1
= control target key start
LH: loop header
LB: loop body
LE: loop exit
PB: predicated region body
PF: predicated region fallthrough
CT: control target
= control target key end

     0   :  { %s2555_s0 = inlined_call_operand.vmem [shape: f32[4,8,64], index: 0, kind: input, shape index: {}]   ;;  %s2556_s1 = inlined_call_operand.vmem [shape: f32[4,16,64], index: 1, kind: input, shape index: {}]   ;;  %s2557_s2 = inlined_call_operand.vmem [shape: f32[4,1,16], index: 2, kind: input, shape index: {}]   ;;  %s2558_s3 = inlined_call_operand.vmem [shape: f32[129,64], index: 3, kind: input, shape index: {}]   ;;  %s2559_s4 = inlined_call_operand.hbm [shape: f32[4,8,16], index: 4, kind: output, shape index: {}]  }
   0x1   :  { %v25_v0 = vld [vmem:[%s2558_s3 + $0x38] sm:$0xff]  ;;  %v24_v2 = vld [vmem:[%s2558_s3 + $0x30] sm:$0xff]  ;;  %v23_v4 = vld [vmem:[%s2558_s3 + $0x28] sm:$0xff] }
   0x2   :  { %v33_v1 = vld [vmem:[%s2558_s3 + $0x78] sm:$0xff]  ;;  %1563 = vmatprep.subr.mxu0 %v25_v0  ;;  %v32_v3 = vld [vmem:[%s2558_s3 + $0x70] sm:$0xff]  ;;  %v31_v5 = vld [vmem:[%s2558_s3 + $0x68] sm:$0xff] }
   0x3   :  { %1591 = vmatprep.subr.mxu1 %v33_v1  ;;  %1564 = vmatpush3.msra.mxu0 %v25_v0  ;;  %v22_v6 = vld [vmem:[%s2558_s3 + $0x20] sm:$0xff]  ;;  %v21_v8 = vld [vmem:[%s2558_s3 + $0x18] sm:$0xff]  ;;  %v20_v10 = vld [vmem:[%s2558_s3 + $0x10] sm:$0xff] }
   0x4   :  { %1592 = vmatpush3.msra.mxu1 %v33_v1  ;;  %1565 = vmatprep.subr.mxu0 %v24_v2  ;;  %v30_v7 = vld [vmem:[%s2558_s3 + $0x60] sm:$0xff]  ;;  %v29_v9 = vld [vmem:[%s2558_s3 + $0x58] sm:$0xff]  ;;  %v28_v11 = vld [vmem:[%s2558_s3 + $0x50] sm:$0xff] }
   0x5   :  { %1593 = vmatprep.subr.mxu1 %v32_v3  ;;  %1566 = vmatpush3.msra.mxu0 %v24_v2 }
   0x6   :  { %1594 = vmatpush3.msra.mxu1 %v32_v3  ;;  %1567 = vmatprep.subr.mxu0 %v23_v4 }
   0x7   :  { %1595 = vmatprep.subr.mxu1 %v31_v5  ;;  %1568 = vmatpush3.msra.mxu0 %v23_v4 }
   0x8   :  { %1596 = vmatpush3.msra.mxu1 %v31_v5  ;;  %1569 = vmatprep.subr.mxu0 %v22_v6 }
   0x9   :  { %1597 = vmatprep.subr.mxu1 %v30_v7  ;;  %1570 = vmatpush3.msra.mxu0 %v22_v6 }
   0xa   :  { %1598 = vmatpush3.msra.mxu1 %v30_v7  ;;  %1571 = vmatprep.subr.mxu0 %v21_v8 }
   0xb   :  { %1599 = vmatprep.subr.mxu1 %v29_v9 }
   0xc   :  { %9 = vsyncpa [#allocation3], 0  ;;  %1572 = vmatpush3.msra.mxu0 %v21_v8  ;;  %1600 = vmatpush3.msra.mxu1 %v29_v9  ;;  %v19_v12 = vld [vmem:[%s2558_s3 + $0x8] sm:$0xff]  ;;  %v18_v14 = vld [vmem:[%s2558_s3] sm:$0xff]  ;;  %vm43_vm0 = vcmask 523264   ;;  %v282_v28 = vlaneseq  ;;  %vm1129_vm1 = vcmask 130112  }
   0xd   :  { %v27_v13 = vld [vmem:[%s2558_s3 + $0x48] sm:$0xff]  ;;  %1573 = vmatprep.subr.mxu0 %v20_v10  ;;  %1601 = vmatprep.subr.mxu1 %v28_v11  ;;  %v26_v15 = vld [vmem:[%s2558_s3 + $0x40] sm:$0xff]  ;;  %v37_v20 = vld [vmem:[%s2556_s1 + $0x10] sm:$0xff]  ;;  %v1784_v34 = vmov 1966171168   ;;  %vm1410_vm2 = vcmask 1041409  }
   0xe   :  { %1574 = vmatpush3.msra.mxu0 %v20_v10  ;;  %1602 = vmatpush3.msra.mxu1 %v28_v11  ;;  %v35_v16 = vld [vmem:[%s2556_s1] sm:$0xff]  ;;  %v36_v18 = vld [vmem:[%s2556_s1 + $0x8] sm:$0xff]  ;;  %v175_v21 = vld [vmem:[%s2555_s0 + $0x10] sm:$0xff]  ;;  %v283_v29 = vshrl.u32 %v282_v28, 7  ;;  %v1119_v30 = vand.u32 127, %v282_v28  ;;  %v280_v35 = vunpack.c.l.s4 %v1784_v34  ;;  %vm1412_vm3 = vcmask 1042434  }
   0xf   :  { %1575 = vmatprep.subr.mxu0 %v19_v12  ;;  %1603 = vmatprep.subr.mxu1 %v27_v13  ;;  %v173_v17 = vld [vmem:[%s2555_s0] sm:$0xff]  ;;  %v174_v19 = vld [vmem:[%s2555_s0 + $0x8] sm:$0xff]  ;;  %v38_v22 = vld [vmem:[%s2556_s1 + $0x18] sm:$0xff]  ;;  %vm1414_vm4 = vcmask 1043459   ;;  %vm1416_vm5 = vcmask 1044484   ;;  %vm1418_vm6 = vcmask 1045509  }
  0x10   :  { %1576 = vmatpush3.msra.mxu0 %v19_v12  ;;  %1604 = vmatpush3.msra.mxu1 %v27_v13  ;;  %v176_v23 = vld [vmem:[%s2555_s0 + $0x18] sm:$0xff]  ;;  %v39_v24 = vld [vmem:[%s2556_s1 + $0x20] sm:$0xff]  ;;  %v40_v25 = vld [vmem:[%s2556_s1 + $0x28] sm:$0xff]  ;;  %v1910_v31 = vsub.s32 %v1119_v30, %v283_v29  ;;  %v1124_v32 = vadd.s32 4294967288, %v1119_v30  ;;  %v281_v37 = vunpack.c.0.s8 %v280_v35  ;;  %v1925_v49 = vsub.s32 0, %v283_v29 }
  0x11   :  { %1577 = vmatprep.subr.mxu0 %v18_v14  ;;  %1605 = vmatprep.subr.mxu1 %v26_v15  ;;  %v41_v26 = vld [vmem:[%s2556_s1 + $0x30] sm:$0xff]  ;;  %v42_v27 = vld [vmem:[%s2556_s1 + $0x38] sm:$0xff]  ;;  %vm1420_vm7 = vcmask 1046534   ;;  %vm1422_vm9 = vcmask 1047559   ;;  %vm1453_vm11 = vcmask 130048  }
  0x12   :  { %1578 = vmatpush3.msra.mxu0 %v18_v14  ;;  %1579 = vmatprep.mubr.msk.f32.mxu0 %vm43_vm0, %v35_v16  ;;  %v1912_v33 = vsub.s32 %v1124_v32, %v283_v29  ;;  %v1914_v39 = vsub.s32 %v281_v37, %v283_v29 }
  0x13   :  { %1606 = vmatpush3.msra.mxu1 %v26_v15  ;;  %1607 = vmatprep.mubr.msk.f32.mxu1 %vm43_vm0, %v173_v17 }
  0x14   :  { %1580 = vmatmul.mubr.msk.f32.vlgmr.msra.gmra.mxu0 %vm43_vm0, %v36_v18  ;;  %1608 = vmatmul.mubr.msk.f32.vlgmr.msra.gmra.mxu1 %vm43_vm0, %v174_v19 }
  0x15   :  { %1582 = vmatprep.mubr.msk.f32.mxu0 %vm43_vm0, %v37_v20  ;;  %1610 = vmatprep.mubr.msk.f32.mxu1 %vm43_vm0, %v175_v21 }
  0x18   :  { %1583 = vmatmul.mubr.msk.f32.gmra.mxu0 %vm43_vm0, %v38_v22  ;;  %1611 = vmatmul.mubr.msk.f32.gmra.mxu1 %vm43_vm0, %v176_v23 }
  0x19   :  { %1585 = vmatprep.mubr.msk.f32.mxu0 %vm43_vm0, %v39_v24 }
  0x1c   :  { %1586 = vmatmul.mubr.msk.f32.gmra.mxu0 %vm43_vm0, %v40_v25 }
  0x1d   :  { %1588 = vmatprep.mubr.msk.f32.mxu0 %vm43_vm0, %v41_v26 }
  0x20   :  { %1589 = vmatmul.mubr.msk.f32.gmra.mxu0 %vm43_vm0, %v42_v27 }
  0xd4   :  { %v1609_v36 = vpop.f32.mrf.mxu1  ;;  %v1918_v44 = vpop.f32.mrf.mxu0 }
  0xd5   :  { %v334_v45 = vrot.slane %v1609_v36, %v1914_v39  ;;  %v327_v55 = vcombine.high %v1609_v36, %v1609_v36 }
  0xd6   :  { %v255_v38 = vpop.f32.mrf.mxu1  ;;  %v1928_v51 = vpop.f32.mrf.mxu0 }
  0xd7   :  { %v278_v40 = vcombine.high %v255_v38, %v255_v38  ;;  %v285_v41 = vrot.slane %v255_v38, %v1914_v39  ;;  %v342_v52 = vcombine.high %v334_v45, %v334_v45  ;;  %v350_v57 = vrot.slane %v334_v45, %v1914_v39 }
  0xd8   :  { %v1936_v59 = vpop.f32.mrf.mxu1  ;;  %v1938_v60 = vpop.f32.mrf.mxu0  ;;  %v341_v1 = vrot.slane %v327_v55, %v1914_v39 }
  0xd9   :  { %v292_v42 = vrot.slane %v278_v40, %v1914_v39  ;;  %v293_v43 = vcombine.high %v285_v41, %v285_v41  ;;  %v301_v47 = vrot.slane %v285_v41, %v1914_v39  ;;  %v425_v61 = vcombine.high %v1936_v59, %v1936_v59 }
  0xda   :  { %v1943_v62 = vrot.slane %v342_v52, %v1914_v39  ;;  %v372_v5 = vcombine.high %v350_v57, %v350_v57  ;;  %v509_v6 = vrot.slane %v350_v57, %v1925_v49  ;;  %v1957_v9 = vpop.f32.mrf.mxu0  ;;  %v1965_v14 = vrot.slane %v341_v1, %v1914_v39  ;;  %v265_v40 = vpop.f32.mrf.mxu1 }
  0xdb   :  { %v294_v46 = vcombine.high %v292_v42, %v292_v42  ;;  %v1923_v48 = vrot.slane %v292_v42, %v1914_v39  ;;  %v315_v50 = vrot.slane %v293_v43, %v1914_v39  ;;  %v477_v54 = vrot.slane %v301_v47, %v1925_v49 }
  0xdc   :  { %v323_v2 = vcombine.high %v301_v47, %v301_v47  ;;  %v439_v10 = vrot.slane %v425_v61, %v1914_v39  ;;  %v513_v11 = vrot.slane %v1943_v62, %v1925_v49  ;;  %v1970_v17 = vpop.f32.mrf.mxu0  ;;  %v517_v18 = vrot.slane %v372_v5, %v1925_v49 }
  0xdd   :  { %v322_v53 = vrot.slane %v294_v46, %v1914_v39  ;;  %v324_v56 = vcombine.high %v1923_v48, %v1923_v48  ;;  %v481_v58 = vrot.slane %v315_v50, %v1925_v49  ;;  %v634_v0 = vadd.f32 %v477_v54, %v1928_v51 }
  0xde   :  { %v635_v4 = vadd.f32 %v1918_v44, %v477_v54  ;;  %v325_v12 = vcombine.high %v315_v50, %v315_v50  ;;  %v485_v15 = vrot.slane %v323_v2, %v1925_v49  ;;  %v651_v20 = vadd.f32 %v1938_v60, %v509_v6  ;;  %v1983_v29 = vpop.f32.mrf.mxu0 }
  0xdf   :  { %v1946_v63 = vrot.slane %v322_v53, %v1925_v49  ;;  %v1951_v3 = vrot.slane %v324_v56, %v1925_v49  ;;  %v636_v7 = vadd.f32 %v481_v58, %v1928_v51  ;;  %v637_v8 = vadd.f32 %v1918_v44, %v481_v58 }
  0xe0   :  { %1618 = vtanh.f32 %v634_v0  ;;  %v326_v19 = vcombine.high %v322_v53, %v322_v53  ;;  %v650_v21 = vadd.f32 %v509_v6, %v1957_v9  ;;  %v441_v22 = vcombine.high %v439_v10, %v439_v10  ;;  %v1993_v42 = vpop.f32.mrf.mxu0 }
  0xe1   :  { %v645_v13 = vadd.f32 %v1918_v44, %v1946_v63  ;;  %v647_v16 = vadd.f32 %v1918_v44, %v1951_v3  ;;  %1620 = vtanh.f32 %v635_v4  ;;  %v1976_v23 = vrot.slane %v325_v12, %v1925_v49 }
  0xe2   :  { %1622 = vtanh.f32 %v636_v7  ;;  %v653_v24 = vadd.f32 %v1938_v60, %v513_v11  ;;  %v455_v25 = vrot.slane %v439_v10, %v1914_v39  ;;  %v343_v26 = vcombine.high %v341_v1, %v341_v1 }
  0xe3   :  { %1624 = vtanh.f32 %v637_v8  ;;  %v525_v27 = vrot.slane %v1965_v14, %v1925_v49  ;;  %v638_v28 = vadd.f32 %v485_v15, %v1928_v51  ;;  %v505_v30 = vrot.slane %v326_v19, %v1925_v49 }
  0xe4   :  { %1626 = vtanh.f32 %v645_v13  ;;  %v655_v32 = vadd.f32 %v1938_v60, %v517_v18  ;;  %v639_v34 = vadd.f32 %v1918_v44, %v485_v15  ;;  %v469_v35 = vrot.slane %v441_v22, %v1914_v39  ;;  %v2044_v15 = vld [vmem:[%s2558_s3 + $0x80] ss:$0 sm:$0xff] }
  0xe5   :  { %1628 = vtanh.f32 %v647_v16  ;;  %v640_v36 = vadd.f32 %v1976_v23, %v1928_v51  ;;  %v471_v37 = vcombine.high %v455_v25, %v455_v25  ;;  %v371_v38 = vrot.slane %v343_v26, %v1914_v39 }
  0xe6   :  { %1630 = vtanh.f32 %v651_v20  ;;  %v659_v41 = vadd.f32 %v1938_v60, %v525_v27  ;;  %v374_v43 = vcombine.high %v1943_v62, %v1943_v62  ;;  %v648_v45 = vadd.f32 %v505_v30, %v1928_v51  ;;  %v2017_v62 = vpop.f32.mrf.mxu0 }
  0xe7   :  { %1632 = vtanh.f32 %v650_v21  ;;  %v1999_v46 = vrot.slane %v455_v25, %v1925_v49  ;;  %v649_v47 = vadd.f32 %v1918_v44, %v505_v30  ;;  %v2003_v50 = vrot.slane %v469_v35, %v1925_v49 }
  0xe8   :  { %1634 = vtanh.f32 %v653_v24  ;;  %v652_v52 = vadd.f32 %v513_v11, %v1957_v9  ;;  %v2008_v53 = vrot.slane %v1936_v59, %v1914_v39  ;;  %v2011_v54 = vrot.slane %v471_v37, %v1925_v49 }
  0xe9   :  { %1636 = vtanh.f32 %v638_v28  ;;  %v376_v55 = vcombine.high %v265_v40, %v265_v40  ;;  %v493_v57 = vrot.slane %v1923_v48, %v1925_v49  ;;  %v383_v58 = vrot.slane %v265_v40, %v1914_v39 }
  0xea   :  { %1638 = vtanh.f32 %v655_v32  ;;  %v654_v61 = vadd.f32 %v517_v18, %v1957_v9  ;;  %v373_v59 = vcombine.high %v1965_v14, %v1965_v14  ;;  %v375_v1 = vcombine.high %v371_v38, %v371_v38 }
  0xeb   :  { %1640 = vtanh.f32 %v639_v34  ;;  %v690_v2 = vadd.f32 %v1999_v46, %v2017_v62  ;;  %v521_v48 = vrot.slane %v374_v43, %v1925_v49  ;;  %v473_v5 = vcombine.high %v469_v35, %v469_v35 }
  0xec   :  { %1642 = vtanh.f32 %v640_v36  ;;  %v692_v6 = vadd.f32 %v2003_v50, %v2017_v62  ;;  %v2034_v8 = vrot.slane %v2008_v53, %v1914_v39  ;;  %v390_v10 = vrot.slane %v376_v55, %v1914_v39 }
  0xed   :  { %v1619_v56 = vpop.eup %1618  ;;  %1644 = vtanh.f32 %v659_v41  ;;  %v694_v11 = vadd.f32 %v2011_v54, %v2017_v62  ;;  %v529_v13 = vrot.slane %v371_v38, %v1925_v49  ;;  %v642_v14 = vadd.f32 %v493_v57, %v1928_v51 }
  0xee   :  { %v2019_v0 = vpop.eup %1620  ;;  %1646 = vtanh.f32 %v648_v45  ;;  %v391_v16 = vcombine.high %v383_v58, %v383_v58  ;;  %v533_v19 = vrot.slane %v373_v59, %v1925_v49  ;;  %v2048_v20 = vrot.slane %v375_v1, %v1925_v49 }
  0xef   :  { %v2025_v4 = vpop.eup %1622  ;;  %1648 = vtanh.f32 %v652_v52  ;;  %v658_v21 = vadd.f32 %v525_v27, %v1957_v9  ;;  %v643_v24 = vadd.f32 %v1918_v44, %v493_v57  ;;  %v440_v25 = vcombine.high %v2008_v53, %v2008_v53 }
  0xf0   :  { %v2030_v7 = vpop.eup %1624  ;;  %1650 = vtanh.f32 %v649_v47  ;;  %v2055_v26 = vrot.slane %v473_v5, %v1925_v49  ;;  %v2060_v32 = vrot.slane %v2034_v8, %v1925_v49  ;;  %v392_v34 = vcombine.high %v390_v10, %v390_v10 }
  0xf1   :  { %v1627_v12 = vpop.eup %1626  ;;  %1652 = vtanh.f32 %v654_v61  ;;  %v2064_v36 = vrot.slane %v390_v10, %v1914_v39  ;;  %v413_v37 = vrot.slane %v391_v16, %v1914_v39  ;;  %v2072_v43 = vrot.slane %v383_v58, %v1914_v39 }
  0xf2   :  { %v1629_v18 = vpop.eup %1628  ;;  %1654 = vtanh.f32 %v690_v2  ;;  %v766_v52 = vmul.f32 %v1619_v56, %v2044_v15  ;;  %v696_v55 = vadd.f32 %v2055_v26, %v2017_v62  ;;  %v2079_v57 = vmul.f32 %v1627_v12, %v2044_v15 }
  0xf3   :  { %v1631_v22 = vpop.eup %1630  ;;  %1656 = vtanh.f32 %v692_v6  ;;  %v2084_v58 = vrot.slane %v392_v34, %v1914_v39  ;;  %v657_v59 = vadd.f32 %v1938_v60, %v521_v48  ;;  %v2088_v1 = vmul.f32 %v1629_v18, %v2044_v15 }
  0xf4   :  { %v1633_v28 = vpop.eup %1632  ;;  %v783_v30 = vmul.f32 %v1631_v22, %v2044_v15  ;;  %1658 = vtanh.f32 %v694_v11  ;;  %v422_v56 = vcombine.high %v2064_v36, %v2064_v36  ;;  %v423_v5 = vcombine.high %v413_v37, %v413_v37 }
  0xf5   :  { %v1635_v27 = vpop.eup %1634  ;;  %1660 = vtanh.f32 %v642_v14  ;;  %v782_v35 = vmul.f32 %v1633_v28, %v2044_v15  ;;  %v541_v6 = vrot.slane %v2072_v43, %v1925_v49  ;;  %v656_v10 = vadd.f32 %v521_v48, %v1957_v9 }
  0xf6   :  { %v2067_v38 = vpop.eup %1636  ;;  %v881_v40 = vsel %vm43_vm0, %v783_v30, 0.0  ;;  %v785_v41 = vmul.f32 %v1635_v27, %v2044_v15  ;;  %1662 = vtanh.f32 %v658_v21  ;;  %v545_v16 = vrot.slane %v413_v37, %v1925_v49 }
  0xf7   :  { %v1639_v45 = vpop.eup %1638  ;;  %882 = vadd.xlane.f32.xlu1 %v881_v40  ;;  %v878_v47 = vsel %vm43_vm0, %v782_v35, 0.0  ;;  %1664 = vtanh.f32 %v643_v24  ;;  %v661_v18 = vadd.f32 %v1938_v60, %v529_v13  ;;  %v830_v22 = vsel %vm43_vm0, %v766_v52, 0.0 }
  0xf8   :  { %v2081_v61 = vpop.eup %1640  ;;  %879 = vadd.xlane.f32.xlu0 %v878_v47  ;;  %v887_v12 = vsel %vm43_vm0, %v785_v41, 0.0  ;;  %v787_v14 = vmul.f32 %v1639_v45, %v2044_v15  ;;  %v767_v24 = vmul.f32 %v2019_v0, %v2044_v15  ;;  %1666 = vtanh.f32 %v696_v55 }
  0xf9   :  { %v2090_v2 = vpop.eup %1642  ;;  %v660_v28 = vadd.f32 %v529_v13, %v1957_v9  ;;  %v424_v30 = vcombine.high %v2084_v58, %v2084_v58  ;;  %v557_v34 = vrot.slane %v2064_v36, %v1925_v49  ;;  %1668 = vtanh.f32 %v657_v59 }
  0xfa   :  { %v1645_v11 = vpop.eup %1644  ;;  %v663_v27 = vadd.f32 %v1938_v60, %v533_v19  ;;  %v553_v37 = vrot.slane %v423_v5, %v1925_v49  ;;  %1670 = vtanh.f32 %v656_v10  ;;  %v662_v0 = vadd.f32 %v533_v19, %v1957_v9 }
  0xfb   :  { %v1647_v21 = vpop.eup %1646  ;;  %888 = vadd.xlane.f32.xlu1 %v887_v12  ;;  %v791_v40 = vmul.f32 %v1645_v11, %v2044_v15  ;;  %v893_v41 = vsel %vm43_vm0, %v787_v14, 0.0  ;;  %v768_v45 = vmul.f32 %v2025_v4, %v2044_v15  ;;  %1672 = vtanh.f32 %v661_v18 }
  0xfc   :  { %v1649_v48 = vpop.eup %1648  ;;  %831 = vadd.xlane.f32.xlu0 %v830_v22  ;;  %v668_v36 = vadd.f32 %v545_v16, %v1983_v29  ;;  %v833_v52 = vsel %vm43_vm0, %v767_v24, 0.0  ;;  %1674 = vtanh.f32 %v660_v28  ;;  %v691_v59 = vadd.f32 %v1993_v42, %v1999_v46 }
  0xfd   :  { %v1651_v35 = vpop.eup %1650  ;;  %v784_v55 = vmul.f32 %v1649_v48, %v2044_v15  ;;  %1676 = vtanh.f32 %v663_v27  ;;  %v667_v5 = vadd.f32 %v1970_v17, %v541_v6  ;;  %v666_v4 = vadd.f32 %v541_v6, %v1983_v29 }
  0xfe   :  { %v1653_v13 = vpop.eup %1652  ;;  %v665_v10 = vadd.f32 %v1938_v60, %v2048_v20  ;;  %v905_v12 = vsel %vm43_vm0, %v791_v40, 0.0  ;;  %1678 = vtanh.f32 %v662_v0  ;;  %v669_v22 = vadd.f32 %v1970_v17, %v545_v16 }
  0xff   :  { %v1655_v47 = vpop.eup %1654  ;;  %894 = vadd.xlane.f32.xlu1 %v893_v41  ;;  %v786_v14 = vmul.f32 %v1653_v13, %v2044_v15  ;;  %1680 = vtanh.f32 %v668_v36  ;;  %v884_v28 = vsel %vm43_vm0, %v784_v55, 0.0  ;;  %v2141_v48 = vmul.f32 %v1651_v35, %v2044_v15 }
 0x100   :  { %v1657_v19 = vpop.eup %1656  ;;  %834 = vadd.xlane.f32.xlu0 %v833_v52  ;;  %v2128_v18 = vmul.f32 %v1655_v47, %v2044_v15  ;;  %1682 = vtanh.f32 %v691_v59  ;;  %v2144_v27 = vmul.f32 %v1647_v21, %v2044_v15  ;;  %v561_v16 = vrot.slane %v2084_v58, %v1925_v49 }
 0x101   :  { %v1659_v11 = vpop.eup %1658  ;;  %v2134_v24 = vmul.f32 %v1657_v19, %v2044_v15  ;;  %v565_v40 = vrot.slane %v422_v56, %v1925_v49  ;;  %v683_v0 = vadd.f32 %v1993_v42, %v2060_v32  ;;  %1684 = vtanh.f32 %v665_v10 }
 0x102   :  { %v2130_v46 = vpop.eup %1660  ;;  %v2137_v6 = vmul.f32 %v1659_v11, %v2044_v15  ;;  %v836_v41 = vsel %vm43_vm0, %v768_v45, 0.0  ;;  %v769_v35 = vmul.f32 %v2030_v7, %v2044_v15  ;;  %1686 = vtanh.f32 %v667_v5 }
 0x103   :  { %v1663_v60 = vpop.eup %1662  ;;  %906 = vadd.xlane.f32.xlu1 %v905_v12  ;;  %v674_v21 = vadd.f32 %v557_v34, %v1983_v29  ;;  %1688 = vtanh.f32 %v669_v22  ;;  %v675_v58 = vadd.f32 %v1970_v17, %v557_v34  ;;  %v673_v56 = vadd.f32 %v1970_v17, %v553_v37 }
 0x104   :  { %885 = vadd.xlane.f32.xlu0 %v884_v28  ;;  %v1665_v13 = vpop.eup %1664  ;;  %v790_v36 = vmul.f32 %v1663_v60, %v2044_v15  ;;  %v890_v47 = vsel %vm43_vm0, %v786_v14, 0.0  ;;  %1690 = vtanh.f32 %v666_v4  ;;  %v693_v45 = vadd.f32 %v1993_v42, %v2003_v50 }
 0x105   :  { %v672_v52 = vadd.f32 %v553_v37, %v1983_v29  ;;  %v1667_v7 = vpop.eup %1666  ;;  %v569_v55 = vrot.slane %v424_v30, %v1925_v49  ;;  %1692 = vtanh.f32 %v683_v0  ;;  %v695_v59 = vadd.f32 %v1993_v42, %v2011_v54 }
 0x106   :  { %v677_v34 = vadd.f32 %v1970_v17, %v561_v16  ;;  %v1669_v19 = vpop.eup %1668  ;;  %v2170_v5 = vrot.slane %v440_v25, %v1914_v39  ;;  %1694 = vtanh.f32 %v674_v21  ;;  %v676_v50 = vadd.f32 %v561_v16, %v1983_v29 }
 0x107   :  { %837 = vadd.xlane.f32.xlu1 %v836_v41  ;;  %v1671_v37 = vpop.eup %1670  ;;  %v839_v30 = vsel %vm43_vm0, %v769_v35, 0.0  ;;  %v771_v4 = vmul.f32 %v2081_v61, %v2044_v15  ;;  %1696 = vtanh.f32 %v675_v58  ;;  %v679_v54 = vadd.f32 %v1970_v17, %v565_v40 }
 0x108   :  { %891 = vadd.xlane.f32.xlu0 %v890_v47  ;;  %v1673_v10 = vpop.eup %1672  ;;  %v902_v11 = vsel %vm43_vm0, %v790_v36, 0.0  ;;  %v770_v39 = vmul.f32 %v2067_v38, %v2044_v15  ;;  %1698 = vtanh.f32 %v693_v45  ;;  %v678_v53 = vadd.f32 %v565_v40, %v1983_v29 }
 0x109   :  { %v1675_v25 = vpop.eup %1674  ;;  %1700 = vtanh.f32 %v695_v59  ;;  %v681_v12 = vadd.f32 %v1970_v17, %v569_v55  ;;  %v470_v61 = vcombine.high %v2034_v8, %v2034_v8  ;;  %v2188_v22 = vrot.slane %v2170_v5, %v1925_v49 }
 0x10a   :  { %v2182_v14 = vpop.eup %1676  ;;  %1702 = vtanh.f32 %v673_v56  ;;  %v680_v38 = vadd.f32 %v569_v55, %v1983_v29  ;;  %v845_v28 = vsel %vm43_vm0, %v771_v4, 0.0  ;;  %v789_v16 = vmul.f32 %v1669_v19, %v2044_v15 }
 0x10b   :  { %840 = vadd.xlane.f32.xlu1 %v839_v30  ;;  %v2191_v60 = vpop.eup %1678  ;;  %1704 = vtanh.f32 %v672_v52  ;;  %v697_v40 = vadd.f32 %v1993_v42, %v2055_v26  ;;  %v842_v8 = vsel %vm43_vm0, %v770_v39, 0.0  ;;  %v788_v41 = vmul.f32 %v1671_v37, %v2044_v15 }
 0x10c   :  { %903 = vadd.xlane.f32.xlu0 %v902_v11  ;;  %v1681_v0 = vpop.eup %1680  ;;  %1706 = vtanh.f32 %v677_v34  ;;  %v2200_v35 = vmul.f32 %v1667_v7, %v2044_v15  ;;  %v2206_v56 = vrot.slane %v470_v61, %v1925_v49  ;;  %v775_v26 = vmul.f32 %v1665_v13, %v2044_v15 }
 0x10d   :  { %v1683_v21 = vpop.eup %1682  ;;  %v2203_v36 = vmul.f32 %v1681_v0, %v2044_v15  ;;  %1708 = vtanh.f32 %v676_v50  ;;  %v899_v52 = vsel %vm43_vm0, %v789_v16, 0.0  ;;  %v685_v7 = vadd.f32 %v1993_v42, %v2188_v22 }
 0x10e   :  { %v1685_v58 = vpop.eup %1684  ;;  %v2210_v47 = vmul.f32 %v1683_v21, %v2044_v15  ;;  %1710 = vtanh.f32 %v679_v54  ;;  %v644_v34 = vadd.f32 %v1946_v63, %v1928_v51  ;;  %v896_v13 = vsel %vm43_vm0, %v788_v41, 0.0 }
 0x10f   :  { %846 = vadd.xlane.f32.xlu1 %v845_v28  ;;  %v1687_v45 = vpop.eup %1686  ;;  %v2216_v55 = vmul.f32 %v1685_v58, %v2044_v15  ;;  %1712 = vtanh.f32 %v678_v53  ;;  %v774_v19 = vmul.f32 %v2130_v46, %v2044_v15  ;;  %v646_v4 = vadd.f32 %v1951_v3, %v1928_v51 }
 0x110   :  { %843 = vadd.xlane.f32.xlu0 %v842_v8  ;;  %v1689_v59 = vpop.eup %1688  ;;  %1714 = vtanh.f32 %v681_v12  ;;  %v857_v63 = vsel %vm43_vm0, %v775_v26, 0.0  ;;  %v793_v11 = vmul.f32 %v1673_v10, %v2044_v15  ;;  %v687_v46 = vadd.f32 %v1993_v42, %v2206_v56 }
 0x111   :  { %v1691_v50 = vpop.eup %1690  ;;  %v2224_v37 = vmul.f32 %v1689_v59, %v2044_v15  ;;  %1716 = vtanh.f32 %v680_v38  ;;  %v854_v53 = vsel %vm43_vm0, %v774_v19, 0.0  ;;  %v792_v12 = vmul.f32 %v1675_v25, %v2044_v15 }
 0x112   :  { %v1693_v30 = vpop.eup %1692  ;;  %1718 = vtanh.f32 %v697_v40  ;;  %v641_v38 = vadd.f32 %v1918_v44, %v1976_v23  ;;  %v911_v40 = vsel %vm43_vm0, %v793_v11, 0.0  ;;  %v795_v25 = vmul.f32 %v2182_v14, %v2044_v15 }
 0x113   :  { %900 = vadd.xlane.f32.xlu1 %v899_v52  ;;  %v1695_v54 = vpop.eup %1694  ;;  %1720 = vtanh.f32 %v685_v7  ;;  %v908_v41 = vsel %vm43_vm0, %v792_v12, 0.0  ;;  %v794_v44 = vmul.f32 %v2191_v60, %v2044_v15  ;;  %v664_v23 = vadd.f32 %v2048_v20, %v1957_v9 }
 0x114   :  { %897 = vadd.xlane.f32.xlu0 %v896_v13  ;;  %v1697_v39 = vpop.eup %1696  ;;  %1722 = vtanh.f32 %v644_v34  ;;  %v2235_v61 = vmul.f32 %v1695_v54, %v2044_v15  ;;  %v917_v59 = vsel %vm43_vm0, %v795_v25, 0.0  ;;  %v799_v60 = vmul.f32 %v1687_v45, %v2044_v15 }
 0x115   :  { %v1699_v51 = vpop.eup %1698  ;;  %v2238_v3 = vmul.f32 %v1697_v39, %v2044_v15  ;;  %1724 = vtanh.f32 %v646_v4  ;;  %v914_v34 = vsel %vm43_vm0, %v794_v44, 0.0  ;;  %v798_v13 = vmul.f32 %v1691_v50, %v2044_v15 }
 0x116   :  { %v1701_v10 = vpop.eup %1700  ;;  %v2243_v28 = vmul.f32 %v1699_v51, %v2044_v15  ;;  %1726 = vtanh.f32 %v687_v46  ;;  %v421_v46 = vcombine.high %v2072_v43, %v2072_v43  ;;  %v929_v39 = vsel %vm43_vm0, %v799_v60, 0.0 }
 0x117   :  { %858 = vadd.xlane.f32.xlu1 %v857_v63  ;;  %v1703_v16 = vpop.eup %1702  ;;  %v2249_v0 = vmul.f32 %v1701_v10, %v2044_v15  ;;  %1728 = vtanh.f32 %v641_v38  ;;  %v815_v50 = vmul.f32 %v1693_v30, %v2044_v15  ;;  %v682_v51 = vadd.f32 %v2060_v32, %v2017_v62 }
 0x118   :  { %855 = vadd.xlane.f32.xlu0 %v854_v53  ;;  %v1705_v8 = vpop.eup %1704  ;;  %v2257_v21 = vmul.f32 %v1703_v16, %v2044_v15  ;;  %1730 = vtanh.f32 %v664_v23  ;;  %v926_v10 = vsel %vm43_vm0, %v798_v13, 0.0  ;;  %v772_v38 = vmul.f32 %v2090_v2, %v2044_v15 }
 0x119   :  { %v1707_v58 = vpop.eup %1706  ;;  %v2260_v14 = vmul.f32 %v1705_v8, %v2044_v15  ;;  %v549_v30 = vrot.slane %v421_v46, %v1925_v49  ;;  %v977_v25 = vsel %vm43_vm0, %v815_v50, 0.0  ;;  %v684_v32 = vadd.f32 %v2188_v22, %v2017_v62 }
 0x11a   :  { %v1709_v26 = vpop.eup %1708  ;;  %v2263_v52 = vmul.f32 %v1707_v58, %v2044_v15  ;;  %1732 = vtanh.f32 %v682_v51  ;;  %v848_v44 = vsel %vm43_vm0, %v772_v38, 0.0  ;;  %v472_v23 = vcombine.high %v2170_v5, %v2170_v5 }
 0x11b   :  { %912 = vadd.xlane.f32.xlu1 %v911_v40  ;;  %v1711_v7 = vpop.eup %1710  ;;  %v2268_v9 = vmul.f32 %v1709_v26, %v2044_v15  ;;  %1734 = vtanh.f32 %v684_v32  ;;  %v670_v60 = vadd.f32 %v549_v30, %v1983_v29  ;;  %v671_v46 = vadd.f32 %v1970_v17, %v549_v30 }
 0x11c   :  { %909 = vadd.xlane.f32.xlu0 %v908_v41  ;;  %v1713_v20 = vpop.eup %1712  ;;  %v2273_v19 = vmul.f32 %v1711_v7, %v2044_v15  ;;  %v863_v38 = vsel %vm43_vm0, %v2079_v57, 0.0  ;;  %v923_v57 = vsel %vm43_vm0, %v2216_v55, 0.0 }
 0x11d   :  { %v1715_v4 = vpop.eup %1714  ;;  %v2276_v54 = vmul.f32 %v1713_v20, %v2044_v15  ;;  %1736 = vtanh.f32 %v670_v60  ;;  %v953_v60 = vsel %vm43_vm0, %v2238_v3, 0.0  ;;  %v1010_v3 = vsel %vm43_vm0, %v2137_v6, 0.0 }
 0x11e   :  { %v1717_v63 = vpop.eup %1716  ;;  %v2279_v45 = vmul.f32 %v1715_v4, %v2044_v15  ;;  %v686_v4 = vadd.f32 %v2206_v56, %v2017_v62  ;;  %v1001_v56 = vsel %vm43_vm0, %v2210_v47, 0.0  ;;  %v959_v6 = vsel %vm43_vm0, %v2263_v52, 0.0 }
 0x11f   :  { %918 = vadd.xlane.f32.xlu1 %v917_v59  ;;  %v1719_v11 = vpop.eup %1718  ;;  %v2286_v53 = vmul.f32 %v1717_v63, %v2044_v15 }
 0x120   :  { %915 = vadd.xlane.f32.xlu0 %v914_v34  ;;  %v1721_v12 = vpop.eup %1720  ;;  %v2294_v16 = vmul.f32 %v1719_v11, %v2044_v15  ;;  %v585_v34 = vrot.slane %v472_v23, %v1925_v49  ;;  %1738 = vtanh.f32 %v686_v4 }
 0x121   :  { %v1723_v43 = vpop.eup %1722  ;;  %v817_v8 = vmul.f32 %v1721_v12, %v2044_v15  ;;  %1740 = vtanh.f32 %v671_v46  ;;  %v968_v52 = vsel %vm43_vm0, %v2286_v53, 0.0 }
 0x122   :  { %v1725_v40 = vpop.eup %1724  ;;  %v776_v2 = vmul.f32 %v1723_v43, %v2044_v15  ;;  %v689_v51 = vadd.f32 %v1993_v42, %v585_v34  ;;  %v869_v42 = vsel %vm43_vm0, %v2088_v1, 0.0  ;;  %v935_v1 = vsel %vm43_vm0, %v2224_v37, 0.0 }
 0x123   :  { %930 = vadd.xlane.f32.xlu1 %v929_v39  ;;  %v1727_v41 = vpop.eup %1726  ;;  %v983_v58 = vsel %vm43_vm0, %v817_v8, 0.0  ;;  %v778_v22 = vmul.f32 %v1725_v40, %v2044_v15  ;;  %v688_v39 = vadd.f32 %v585_v34, %v2017_v62  ;;  %v950_v37 = vsel %vm43_vm0, %v2235_v61, 0.0 }
 0x124   :  { %927 = vadd.xlane.f32.xlu0 %v926_v10  ;;  %v819_v26 = vmul.f32 %v1727_v41, %v2044_v15  ;;  %v1729_v7 = vpop.eup %1728  ;;  %v860_v59 = vsel %vm43_vm0, %v776_v2, 0.0  ;;  %v932_v10 = vsel %vm43_vm0, %v2203_v36, 0.0  ;;  %v1004_v34 = vsel %vm43_vm0, %v2134_v24, 0.0 }
 0x125   :  { %v1731_v20 = vpop.eup %1730  ;;  %v773_v5 = vmul.f32 %v1729_v7, %v2044_v15  ;;  %v866_v63 = vsel %vm43_vm0, %v778_v22, 0.0  ;;  %1742 = vtanh.f32 %v688_v39  ;;  %v1013_v61 = vsel %vm43_vm0, %v2249_v0, 0.0 }
 0x126   :  { %v989_v13 = vsel %vm43_vm0, %v819_v26, 0.0  ;;  %v796_v11 = vmul.f32 %v1731_v20, %v2044_v15  ;;  %1744 = vtanh.f32 %v689_v51  ;;  %v998_v20 = vsel %vm43_vm0, %v2128_v18, 0.0 }
 0x127   :  { %978 = vadd.xlane.f32.xlu1 %v977_v25  ;;  %v851_v29 = vsel %vm43_vm0, %v773_v5, 0.0  ;;  %v1733_v12 = vpop.eup %1732  ;;  %v875_v18 = vsel %vm43_vm0, %v2141_v48, 0.0  ;;  %v947_v24 = vsel %vm43_vm0, %v2257_v21, 0.0  ;;  %v944_v0 = vsel %vm43_vm0, %v2260_v14, 0.0 }
 0x128   :  { %849 = vadd.xlane.f32.xlu0 %v848_v44  ;;  %v920_v50 = vsel %vm43_vm0, %v796_v11, 0.0  ;;  %v814_v17 = vmul.f32 %v1733_v12, %v2044_v15  ;;  %v1735_v62 = vpop.eup %1734  ;;  %v956_v48 = vsel %vm43_vm0, %v2268_v9, 0.0  ;;  %v962_v21 = vsel %vm43_vm0, %v2276_v54, 0.0 }
 0x129   :  { %v816_v47 = vmul.f32 %v1735_v62, %v2044_v15  ;;  %v971_v14 = vsel %vm43_vm0, %v2279_v45, 0.0  ;;  %v1019_v9 = vsel %vm43_vm0, %v2294_v16, 0.0 }
 0x12a   :  { %v974_v43 = vsel %vm43_vm0, %v814_v17, 0.0  ;;  %v1737_v40 = vpop.eup %1736 }
 0x12b   :  { %984 = vadd.xlane.f32.xlu1 %v983_v58  ;;  %v980_v36 = vsel %vm43_vm0, %v816_v47, 0.0  ;;  %v802_v30 = vmul.f32 %v1737_v40, %v2044_v15 }
 0x12c   :  { %861 = vadd.xlane.f32.xlu0 %v860_v59 }
 0x12d   :  { %v1739_v25 = vpop.eup %1738  ;;  %v938_v41 = vsel %vm43_vm0, %v802_v30, 0.0 }
 0x12e   :  { %v1741_v8 = vpop.eup %1740  ;;  %v818_v32 = vmul.f32 %v1739_v25, %v2044_v15 }
 0x12f   :  { %990 = vadd.xlane.f32.xlu1 %v989_v13  ;;  %v803_v2 = vmul.f32 %v1741_v8, %v2044_v15 }
 0x130   :  { %867 = vadd.xlane.f32.xlu0 %v866_v63  ;;  %v986_v58 = vsel %vm43_vm0, %v818_v32, 0.0 }
 0x131   :  { %v941_v55 = vsel %vm43_vm0, %v803_v2, 0.0 }
 0x132   :  { %v1743_v44 = vpop.eup %1742 }
 0x133   :  { %852 = vadd.xlane.f32.xlu1 %v851_v29  ;;  %v1745_v23 = vpop.eup %1744  ;;  %v820_v26 = vmul.f32 %v1743_v44, %v2044_v15 }
 0x134   :  { %921 = vadd.xlane.f32.xlu0 %v920_v50  ;;  %v821_v7 = vmul.f32 %v1745_v23, %v2044_v15  ;;  %v1007_v15 = vsel %vm43_vm0, %v2243_v28, 0.0  ;;  %v872_v28 = vsel %vm43_vm0, %v2144_v27, 0.0  ;;  %v965_v27 = vsel %vm43_vm0, %v2273_v19, 0.0 }
 0x135   :  { %v992_v59 = vsel %vm43_vm0, %v820_v26, 0.0  ;;  %v1016_v19 = vsel %vm43_vm0, %v2200_v35, 0.0 }
 0x136   :  { %v995_v22 = vsel %vm43_vm0, %v821_v7, 0.0 }
 0x137   :  { %1002 = vadd.xlane.f32.xlu1 %v1001_v56 }
 0x138   :  { %933 = vadd.xlane.f32.xlu0 %v932_v10 }
 0x13b   :  { %864 = vadd.xlane.f32.xlu1 %v863_v38 }
 0x13c   :  { %975 = vadd.xlane.f32.xlu0 %v974_v43 }
 0x13f   :  { %870 = vadd.xlane.f32.xlu1 %v869_v42 }
 0x140   :  { %981 = vadd.xlane.f32.xlu0 %v980_v36 }
 0x143   :  { %924 = vadd.xlane.f32.xlu1 %v923_v57 }
 0x144   :  { %939 = vadd.xlane.f32.xlu0 %v938_v41 }
 0x147   :  { %936 = vadd.xlane.f32.xlu1 %v935_v1 }
 0x148   :  { %987 = vadd.xlane.f32.xlu0 %v986_v58 }
 0x14b   :  { %942 = vadd.xlane.f32.xlu1 %v941_v55 }
 0x14c   :  { %993 = vadd.xlane.f32.xlu0 %v992_v59 }
 0x14f   :  { %996 = vadd.xlane.f32.xlu1 %v995_v22 }
 0x150   :  { %951 = vadd.xlane.f32.xlu0 %v950_v37 }
 0x153   :  { %954 = vadd.xlane.f32.xlu1 %v953_v60 }
 0x154   :  { %999 = vadd.xlane.f32.xlu0 %v998_v20 }
 0x157   :  { %1008 = vadd.xlane.f32.xlu1 %v1007_v15 }
 0x158   :  { %1005 = vadd.xlane.f32.xlu0 %v1004_v34 }
 0x15b   :  { %1014 = vadd.xlane.f32.xlu1 %v1013_v61 }
 0x15c   :  { %1011 = vadd.xlane.f32.xlu0 %v1010_v3 }
 0x15f   :  { %876 = vadd.xlane.f32.xlu1 %v875_v18 }
 0x160   :  { %873 = vadd.xlane.f32.xlu0 %v872_v28 }
 0x163   :  { %948 = vadd.xlane.f32.xlu1 %v947_v24 }
 0x164   :  { %945 = vadd.xlane.f32.xlu0 %v944_v0 }
 0x167   :  { %960 = vadd.xlane.f32.xlu1 %v959_v6 }
 0x168   :  { %957 = vadd.xlane.f32.xlu0 %v956_v48 }
 0x16b   :  { %966 = vadd.xlane.f32.xlu1 %v965_v27 }
 0x16c   :  { %963 = vadd.xlane.f32.xlu0 %v962_v21 }
 0x16f   :  { %972 = vadd.xlane.f32.xlu1 %v971_v14 }
 0x170   :  { %969 = vadd.xlane.f32.xlu0 %v968_v52 }
 0x173   :  { %1020 = vadd.xlane.f32.xlu1 %v1019_v9 }
 0x174   :  { %1017 = vadd.xlane.f32.xlu0 %v1016_v19 }
 0x180   :  { %v883_v13 = vpop.xlane.xlu1 %882 }
 0x181   :  { %v1201_v54 = vrot.slane %v883_v13, %v1912_v33  ;;  %v880_v5 = vpop.xlane.xlu0 %879 }
 0x182   :  { %v1197_v45 = vrot.slane %v880_v5, %v1910_v31 }
 0x184   :  { %v1202_v4 = vsel %vm1129_vm1, %v1201_v54, %v1197_v45  ;;  %v889_v63 = vpop.xlane.xlu1 %888 }
 0x185   :  { %v1210_v53 = vrot.slane %v889_v63, %v1912_v33  ;;  %v832_v11 = vpop.xlane.xlu0 %831 }
 0x186   :  { %v1123_v16 = vrot.slane %v832_v11, %v1910_v31 }
 0x188   :  { %v895_v29 = vpop.xlane.xlu1 %894 }
 0x189   :  { %v835_v46 = vpop.xlane.xlu0 %834  ;;  %v1219_v43 = vrot.slane %v895_v29, %v1912_v33 }
 0x18a   :  { %v1128_v35 = vrot.slane %v835_v46, %v1912_v33 }
 0x18c   :  { %v1130_v39 = vsel %vm1129_vm1, %v1128_v35, %v1123_v16  ;;  %v907_v50 = vpop.xlane.xlu1 %906 }
 0x18d   :  { %v886_v12 = vpop.xlane.xlu0 %885  ;;  %v1237_v57 = vrot.slane %v907_v50, %v1912_v33 }
 0x18e   :  { %v1206_v56 = vrot.slane %v886_v12, %v1910_v31 }
 0x190   :  { %v1211_v51 = vsel %vm1129_vm1, %v1210_v53, %v1206_v56  ;;  %v838_v10 = vpop.xlane.xlu1 %837 }
 0x191   :  { %v1424_v17 = vsel %vm1410_vm2, %v1211_v51, %v1202_v4  ;;  %v1134_v62 = vrot.slane %v838_v10, %v1910_v31  ;;  %v892_v38 = vpop.xlane.xlu0 %891 }
 0x192   :  { %v1215_v47 = vrot.slane %v892_v38, %v1910_v31 }
 0x194   :  { %v1220_v40 = vsel %vm1129_vm1, %v1219_v43, %v1215_v47  ;;  %v841_v42 = vpop.xlane.xlu1 %840 }
 0x195   :  { %v1425_v36 = vsel %vm1412_vm3, %v1220_v40, %v1424_v17  ;;  %v1138_v30 = vrot.slane %v841_v42, %v1912_v33  ;;  %v904_v25 = vpop.xlane.xlu0 %903  ;;  %v1023_v42 = vld [vmem:[%s2557_s2 + $0x1] sm:$0x1] }
 0x196   :  { %v1233_v8 = vrot.slane %v904_v25, %v1910_v31  ;;  %vm1027_vm8 = vcmp.gt.f32.partialorder %v1023_v42, 0.5 }
 0x197   :  { %v1139_v41 = vsel %vm1129_vm1, %v1138_v30, %v1134_v62 }
 0x198   :  { %v1411_v32 = vsel %vm1410_vm2, %v1139_v41, %v1130_v39  ;;  %v1238_v44 = vsel %vm1129_vm1, %v1237_v57, %v1233_v8  ;;  %v847_v1 = vpop.xlane.xlu1 %846 }
 0x199   :  { %v1147_v2 = vrot.slane %v847_v1, %v1912_v33  ;;  %v844_v23 = vpop.xlane.xlu0 %843 }
 0x19a   :  { %v1143_v58 = vrot.slane %v844_v23, %v1910_v31 }
 0x19c   :  { %v1148_v26 = vsel %vm1129_vm1, %v1147_v2, %v1143_v58  ;;  %v901_v55 = vpop.xlane.xlu1 %900 }
 0x19d   :  { %v1413_v7 = vsel %vm1412_vm3, %v1148_v26, %v1411_v32  ;;  %v1228_v59 = vrot.slane %v901_v55, %v1912_v33  ;;  %v898_v22 = vpop.xlane.xlu0 %897 }
 0x19e   :  { %v1224_v37 = vrot.slane %v898_v22, %v1910_v31 }
 0x1a0   :  { %v1229_v60 = vsel %vm1129_vm1, %v1228_v59, %v1224_v37  ;;  %v859_v20 = vpop.xlane.xlu1 %858 }
 0x1a1   :  { %v1426_v15 = vsel %vm1414_vm4, %v1229_v60, %v1425_v36  ;;  %v1165_v34 = vrot.slane %v859_v20, %v1912_v33  ;;  %v856_v61 = vpop.xlane.xlu0 %855 }
 0x1a2   :  { %v1161_v3 = vrot.slane %v856_v61, %v1910_v31  ;;  %v1427_v18 = vsel %vm1416_vm5, %v1238_v44, %v1426_v15  ;;  %v1785_v44 = vmov 0  }
 0x1a3   :  { %v1031_v1 = vsel %vm1027_vm8, 1, %v1785_v44 }
 0x1a4   :  { %v1166_v28 = vsel %vm1129_vm1, %v1165_v34, %v1161_v3  ;;  %v913_v24 = vpop.xlane.xlu1 %912  ;;  %v1041_v22 = vrot.slane %v1031_v1, %v1925_v49 }
 0x1a5   :  { %v1246_v0 = vrot.slane %v913_v24, %v1912_v33  ;;  %v910_v6 = vpop.xlane.xlu0 %909 }
 0x1a6   :  { %v1242_v48 = vrot.slane %v910_v6, %v1910_v31  ;;  %vm1051_vm10 = vcmp.eq.s32.totalorder %v1041_v22, 1 }
 0x1a8   :  { %v1247_v27 = vsel %vm1129_vm1, %v1246_v0, %v1242_v48  ;;  %v919_v21 = vpop.xlane.xlu1 %918 }
 0x1a9   :  { %v1255_v14 = vrot.slane %v919_v21, %v1912_v33  ;;  %v916_v52 = vpop.xlane.xlu0 %915  ;;  %v1428_v9 = vsel %vm1418_vm6, %v1247_v27, %v1427_v18 }
 0x1aa   :  { %v1251_v19 = vrot.slane %v916_v52, %v1910_v31 }
 0x1ac   :  { %v1256_v13 = vsel %vm1129_vm1, %v1255_v14, %v1251_v19  ;;  %v931_v54 = vpop.xlane.xlu1 %930 }
 0x1ad   :  { %v1273_v5 = vrot.slane %v931_v54, %v1912_v33  ;;  %v928_v45 = vpop.xlane.xlu0 %927  ;;  %v1429_v4 = vsel %vm1420_vm7, %v1256_v13, %v1428_v9 }
 0x1ae   :  { %v1269_v63 = vrot.slane %v928_v45, %v1910_v31 }
 0x1b0   :  { %v1274_v53 = vsel %vm1129_vm1, %v1273_v5, %v1269_v63  ;;  %v979_v11 = vpop.xlane.xlu1 %978 }
 0x1b1   :  { %v850_v16 = vpop.xlane.xlu0 %849  ;;  %v1345_v29 = vrot.slane %v979_v11, %v1912_v33 }
 0x1b2   :  { %v1152_v10 = vrot.slane %v850_v16, %v1910_v31 }
 0x1b4   :  { %v985_v46 = vpop.xlane.xlu1 %984 }
 0x1b5   :  { %v862_v35 = vpop.xlane.xlu0 %861  ;;  %v1354_v39 = vrot.slane %v985_v46, %v1912_v33 }
 0x1b6   :  { %v1170_v25 = vrot.slane %v862_v35, %v1910_v31 }
 0x1b8   :  { %v991_v50 = vpop.xlane.xlu1 %990 }
 0x1b9   :  { %v868_v12 = vpop.xlane.xlu0 %867  ;;  %v1363_v56 = vrot.slane %v991_v50, %v1912_v33 }
 0x1ba   :  { %v1179_v26 = vrot.slane %v868_v12, %v1910_v31 }
 0x1bc   :  { %v853_v51 = vpop.xlane.xlu1 %852 }
 0x1bd   :  { %v922_v17 = vpop.xlane.xlu0 %921  ;;  %v1156_v62 = vrot.slane %v853_v51, %v1912_v33 }
 0x1be   :  { %v1260_v34 = vrot.slane %v922_v17, %v1910_v31 }
 0x1bf   :  { %v1157_v38 = vsel %vm1129_vm1, %v1156_v62, %v1152_v10 }
 0x1c0   :  { %v1415_v43 = vsel %vm1414_vm4, %v1157_v38, %v1413_v7  ;;  %v2437_v47 = vpop.xlane.xlu1 %1002  ;;  %v1022_v38 = vld [vmem:[%s2557_s2] sm:$0x1] }
 0x1c1   :  { %v934_v40 = vpop.xlane.xlu0 %933  ;;  %v1417_v36 = vsel %vm1416_vm5, %v1166_v28, %v1415_v43  ;;  %v1381_v17 = vrot.slane %v2437_v47, %v1912_v33  ;;  %vm1026_vm12 = vcmp.gt.f32.partialorder %v1022_v38, 0.5 }
 0x1c2   :  { %v1278_v6 = vrot.slane %v934_v40, %v1910_v31 }
 0x1c4   :  { %v865_v30 = vpop.xlane.xlu1 %864 }
 0x1c5   :  { %v1174_v57 = vrot.slane %v865_v30, %v1912_v33  ;;  %v976_v8 = vpop.xlane.xlu0 %975 }
 0x1c6   :  { %v1341_v41 = vrot.slane %v976_v8, %v1910_v31 }
 0x1c7   :  { %v1175_v32 = vsel %vm1129_vm1, %v1174_v57, %v1170_v25 }
 0x1c8   :  { %v1346_v2 = vsel %vm1129_vm1, %v1345_v29, %v1341_v41  ;;  %v871_v23 = vpop.xlane.xlu1 %870  ;;  %v1419_v58 = vsel %vm1418_vm6, %v1175_v32, %v1417_v36  ;;  %v1030_v41 = vsel %vm1026_vm12, 1, %v1785_v44 }
 0x1c9   :  { %v1183_v55 = vrot.slane %v871_v23, %v1912_v33  ;;  %v982_v7 = vpop.xlane.xlu0 %981 }
 0x1ca   :  { %v1350_v59 = vrot.slane %v982_v7, %v1910_v31 }
 0x1cb   :  { %v1184_v37 = vsel %vm1129_vm1, %v1183_v55, %v1179_v26 }
 0x1cc   :  { %v1355_v60 = vsel %vm1129_vm1, %v1354_v39, %v1350_v59  ;;  %v925_v20 = vpop.xlane.xlu1 %924  ;;  %v2457_v15 = vsel %vm1420_vm7, %v1184_v37, %v1419_v58  ;;  %v1037_v58 = vrot.slane %v1030_v41, %v1925_v49 }
 0x1cd   :  { %v1438_v61 = vsel %vm1410_vm2, %v1355_v60, %v1346_v2  ;;  %v1264_v3 = vrot.slane %v925_v20, %v1912_v33  ;;  %v940_v18 = vpop.xlane.xlu0 %939 }
 0x1ce   :  { %v1287_v5 = vrot.slane %v940_v18, %v1910_v31  ;;  %vm1050_vm13 = vcmp.eq.s32.totalorder %v1037_v58, 1 }
 0x1cf   :  { %v1265_v28 = vsel %vm1129_vm1, %v1264_v3, %v1260_v34 }
 0x1d0   :  { %v937_v24 = vpop.xlane.xlu1 %936  ;;  %v1430_v0 = vsel %vm1422_vm9, %v1265_v28, %v1429_v4 }
 0x1d1   :  { %v1282_v48 = vrot.slane %v937_v24, %v1912_v33  ;;  %v988_v27 = vpop.xlane.xlu0 %987  ;;  %v2466_v21 = vsel %vm1051_vm10, -inf, %v1430_v0  ;;  %v1024_v24 = vld [vmem:[%s2557_s2 + $0x2] sm:$0x1] }
 0x1d2   :  { %v1359_v14 = vrot.slane %v988_v27, %v1910_v31  ;;  %v1457_v52 = vsel %vm1453_vm11, %v2466_v21, -inf  ;;  %vm1028_vm14 = vcmp.gt.f32.partialorder %v1024_v24, 0.5 }
 0x1d3   :  { %v1283_v9 = vsel %vm1129_vm1, %v1282_v48, %v1278_v6  ;;  %1458 = vmax.xlane.f32.xlu1 %v1457_v52 }
 0x1d4   :  { %v1431_v19 = vsel %vm1410_vm2, %v1283_v9, %v1274_v53  ;;  %v1364_v13 = vsel %vm1129_vm1, %v1363_v56, %v1359_v14  ;;  %v943_v54 = vpop.xlane.xlu1 %942 }
 0x1d5   :  { %v1439_v45 = vsel %vm1412_vm3, %v1364_v13, %v1438_v61  ;;  %v1291_v4 = vrot.slane %v943_v54, %v1912_v33  ;;  %v994_v63 = vpop.xlane.xlu0 %993 }
 0x1d6   :  { %v1368_v46 = vrot.slane %v994_v63, %v1910_v31 }
 0x1d7   :  { %v1292_v11 = vsel %vm1129_vm1, %v1291_v4, %v1287_v5  ;;  %v1032_v5 = vsel %vm1028_vm14, 1, %v1785_v44 }
 0x1d8   :  { %v1432_v16 = vsel %vm1412_vm3, %v1292_v11, %v1431_v19  ;;  %v997_v29 = vpop.xlane.xlu1 %996  ;;  %v1025_v19 = vld [vmem:[%s2557_s2 + $0x3] sm:$0x1]  ;;  %s1786_s2 = smov [#allocation2]  }
 0x1d9   :  { %v1372_v35 = vrot.slane %v997_v29, %v1912_v33  ;;  %v952_v53 = vpop.xlane.xlu0 %951  ;;  %vm1029_vm15 = vcmp.gt.f32.partialorder %v1025_v19, 0.5  ;;  %s1511_s26 = sshll.u32 %s1786_s2, 4  ;;  %s1512_s26 = int_to_ptr.vmem [resolvable:$true] %s1511_s26 }
 0x1da   :  { %v1305_v56 = vrot.slane %v952_v53, %v1910_v31  ;;  %s1762_s27 = scalar_lea.vmem %s1512_s26, 512  ;;  %p1767_p1 = scmp.lt.s32.totalorder %s1512_s26, %s1512_s26 }
 0x1db   :  { %v1373_v39 = vsel %vm1129_vm1, %v1372_v35, %v1368_v46  ;;  %v1033_v35 = vsel %vm1029_vm15, 1, %v1785_v44  ;;  %p1763_p0 = scmp.ne.s32.totalorder %s1512_s26, %s1762_s27  ;;  %p1768_p2 = scmp.lt.s32.totalorder %s1762_s27, %s1762_s27 }
 0x1dc   :  { %v1440_v50 = vsel %vm1414_vm4, %v1373_v39, %v1439_v45  ;;  %v955_v12 = vpop.xlane.xlu1 %954 }
 0x1dd   :  { %v1309_v51 = vrot.slane %v955_v12, %v1912_v33  ;;  %v1000_v10 = vpop.xlane.xlu0 %999  ;;  %p1769_p3 = por %p1768_p2, %p1767_p1 }
 0x1de   :  { %v1377_v62 = vrot.slane %v1000_v10, %v1910_v31 }
 0x1df   :  { %v1310_v43 = vsel %vm1129_vm1, %v1309_v51, %v1305_v56  ;;  %v1049_v56 = vrot.slane %v1033_v35, %v1925_v49  ;;  %p1770_p4 = pnand %p1769_p3, %p1763_p0 }
 0x1e0   :  { %v1382_v40 = vsel %vm1129_vm1, %v1381_v17, %v1377_v62  ;;  %v1009_v42 = vpop.xlane.xlu1 %1008 }
 0x1e1   :  { %v1441_v36 = vsel %vm1416_vm5, %v1382_v40, %v1440_v50  ;;  %v1390_v30 = vrot.slane %v1009_v42, %v1912_v33  ;;  %v1006_v25 = vpop.xlane.xlu0 %1005  ;;  %vm1053_vm2 = vcmp.eq.s32.totalorder %v1049_v56, 1 }
 0x1e2   :  { %v1386_v57 = vrot.slane %v1006_v25, %v1910_v31 }
 0x1e4   :  { %v1391_v47 = vsel %vm1129_vm1, %v1390_v30, %v1386_v57  ;;  %v1015_v8 = vpop.xlane.xlu1 %1014 }
 0x1e5   :  { %v1399_v32 = vrot.slane %v1015_v8, %v1912_v33  ;;  %v1012_v1 = vpop.xlane.xlu0 %1011  ;;  %v1442_v2 = vsel %vm1418_vm6, %v1391_v47, %v1441_v36 }
 0x1e6   :  { %v1395_v23 = vrot.slane %v1012_v1, %v1910_v31 }
 0x1e8   :  { %v1400_v26 = vsel %vm1129_vm1, %v1399_v32, %v1395_v23  ;;  %v877_v55 = vpop.xlane.xlu1 %876 }
 0x1e9   :  { %v1192_v7 = vrot.slane %v877_v55, %v1912_v33  ;;  %v874_v59 = vpop.xlane.xlu0 %873  ;;  %v1443_v22 = vsel %vm1420_vm7, %v1400_v26, %v1442_v2 }
 0x1ea   :  { %v1188_v37 = vrot.slane %v874_v59, %v1910_v31 }
 0x1ec   :  { %v949_v60 = vpop.xlane.xlu1 %948  ;;  %v1193_v20 = vsel %vm1129_vm1, %v1192_v7, %v1188_v37 }
 0x1ed   :  { %v1300_v34 = vrot.slane %v949_v60, %v1912_v33  ;;  %v946_v61 = vpop.xlane.xlu0 %945  ;;  %v1423_v3 = vsel %vm1422_vm9, %v1193_v20, %v2457_v15 }
 0x1ee   :  { %v1296_v18 = vrot.slane %v946_v61, %v1910_v31  ;;  %v1449_v28 = vsel %vm1050_vm13, -inf, %v1423_v3 }
 0x1ef   :  { %v1454_v0 = vsel %vm1453_vm11, %v1449_v28, -inf }
 0x1f0   :  { %v1301_v6 = vsel %vm1129_vm1, %v1300_v34, %v1296_v18  ;;  %1455 = vmax.xlane.f32.xlu0 %v1454_v0  ;;  %v961_v48 = vpop.xlane.xlu1 %960 }
 0x1f1   :  { %v1433_v27 = vsel %vm1414_vm4, %v1301_v6, %v1432_v16  ;;  %v1318_v14 = vrot.slane %v961_v48, %v1912_v33  ;;  %v958_v52 = vpop.xlane.xlu0 %957  ;;  %v1045_v16 = vrot.slane %v1032_v5, %v1925_v49 }
 0x1f2   :  { %v1314_v15 = vrot.slane %v958_v52, %v1910_v31  ;;  %v1434_v9 = vsel %vm1416_vm5, %v1310_v43, %v1433_v27 }
 0x1f3   :  { %vm1052_vm0 = vcmp.eq.s32.totalorder %v1045_v16, 1 }
 0x1f4   :  { %v1319_v13 = vsel %vm1129_vm1, %v1318_v14, %v1314_v15  ;;  %v967_v54 = vpop.xlane.xlu1 %966 }
 0x1f5   :  { %v1327_v45 = vrot.slane %v967_v54, %v1912_v33  ;;  %v964_v4 = vpop.xlane.xlu0 %963  ;;  %v1435_v63 = vsel %vm1418_vm6, %v1319_v13, %v1434_v9 }
 0x1f6   :  { %v1323_v11 = vrot.slane %v964_v4, %v1910_v31 }
 0x1f8   :  { %v1328_v29 = vsel %vm1129_vm1, %v1327_v45, %v1323_v11  ;;  %v973_v46 = vpop.xlane.xlu1 %972 }
 0x1f9   :  { %v1336_v53 = vrot.slane %v973_v46, %v1912_v33  ;;  %v970_v39 = vpop.xlane.xlu0 %969  ;;  %v1436_v50 = vsel %vm1420_vm7, %v1328_v29, %v1435_v63 }
 0x1fa   :  { %v1332_v12 = vrot.slane %v970_v39, %v1910_v31 }
 0x1fc   :  { %v1021_v51 = vpop.xlane.xlu1 %1020  ;;  %v1337_v10 = vsel %vm1129_vm1, %v1336_v53, %v1332_v12 }
 0x1fd   :  { %v1408_v17 = vrot.slane %v1021_v51, %v1912_v33  ;;  %v1018_v62 = vpop.xlane.xlu0 %1017  ;;  %v1437_v38 = vsel %vm1422_vm9, %v1337_v10, %v1436_v50 }
 0x1fe   :  { %v1404_v44 = vrot.slane %v1018_v62, %v1910_v31  ;;  %v1451_v43 = vsel %vm1052_vm0, -inf, %v1437_v38 }
 0x1ff   :  { %v1460_v40 = vsel %vm1453_vm11, %v1451_v43, -inf }
 0x200   :  { %1461 = vmax.xlane.f32.xlu0 %v1460_v40  ;;  %v1409_v42 = vsel %vm1129_vm1, %v1408_v17, %v1404_v44 }
 0x201   :  { %v1444_v36 = vsel %vm1422_vm9, %v1409_v42, %v1443_v22 }
 0x202   :  { %v1452_v49 = vsel %vm1053_vm2, -inf, %v1444_v36 }
 0x203   :  { %v1463_v30 = vsel %vm1453_vm11, %v1452_v49, -inf }
 0x204   :  { %1464 = vmax.xlane.f32.xlu1 %v1463_v30 }
 0x25c   :  { %v1459_v25 = vpop.xlane.xlu1 %1458 }
 0x25d   :  { %v1467_v33 = vsub.f32 %v2466_v21, %v1459_v25 }
 0x25f   :  { %v1472_v57 = vmul.f32 1.442695, %v1467_v33 }
 0x261   :  { %1746 = vpow2.f32 %v1472_v57 }
 0x26e   :  { %v1747_v47 = vpop.eup %1746 }
 0x26f   :  { %v1481_v31 = vsel %vm1453_vm11, %v1747_v47, 0.0 }
 0x270   :  { %1482 = vadd.xlane.f32.xlu1 %v1481_v31 }
 0x279   :  { %v1456_v8 = vpop.xlane.xlu0 %1455 }
 0x27a   :  { %v1466_v41 = vsub.f32 %v1449_v28, %v1456_v8 }
 0x27c   :  { %v1470_v32 = vmul.f32 1.442695, %v1466_v41 }
 0x27e   :  { %1748 = vpow2.f32 %v1470_v32 }
 0x289   :  { %v1462_v1 = vpop.xlane.xlu0 %1461 }
 0x28a   :  { %v1468_v2 = vsub.f32 %v1451_v43, %v1462_v1 }
 0x28b   :  { %v1749_v23 = vpop.eup %1748 }
 0x28c   :  { %v1474_v58 = vmul.f32 1.442695, %v1468_v2  ;;  %v1478_v26 = vsel %vm1453_vm11, %v1749_v23, 0.0 }
 0x28d   :  { %v1465_v55 = vpop.xlane.xlu1 %1464  ;;  %1479 = vadd.xlane.f32.xlu0 %v1478_v26 }
 0x28e   :  { %1750 = vpow2.f32 %v1474_v58  ;;  %v1469_v21 = vsub.f32 %v1452_v49, %v1465_v55 }
 0x290   :  { %v1476_v7 = vmul.f32 1.442695, %v1469_v21 }
 0x292   :  { %1752 = vpow2.f32 %v1476_v7 }
 0x29b   :  { %v1751_v59 = vpop.eup %1750 }
 0x29c   :  { %v1484_v22 = vsel %vm1453_vm11, %v1751_v59, 0.0 }
 0x29d   :  { %1485 = vadd.xlane.f32.xlu0 %v1484_v22 }
 0x29f   :  { %v1753_v37 = vpop.eup %1752 }
 0x2a0   :  { %v1487_v60 = vsel %vm1453_vm11, %v1753_v37, 0.0 }
 0x2a1   :  { %1488 = vadd.xlane.f32.xlu1 %v1487_v60 }
 0x2f9   :  { %v1483_v20 = vpop.xlane.xlu1 %1482 }
 0x2fa   :  { %1754 = vlog2.f32 %v1483_v20 }
 0x307   :  { %v1755_v34 = vpop.eup %1754 }
 0x308   :  { %v1493_v61 = vmul.f32 0.6931472, %v1755_v34 }
 0x30a   :  { %v1499_v3 = vsub.f32 %v1467_v33, %v1493_v61 }
 0x30c   :  { %1503 = vst.msk [vmem:[#allocation2 + $0x8] sm:$0xff] %vm1453_vm11, %v1499_v3 }
 0x316   :  { %v1480_v18 = vpop.xlane.xlu0 %1479 }
 0x317   :  { %1756 = vlog2.f32 %v1480_v18 }
 0x324   :  { %v1757_v28 = vpop.eup %1756 }
 0x325   :  { %v1491_v24 = vmul.f32 0.6931472, %v1757_v28 }
 0x326   :  { %v1486_v0 = vpop.xlane.xlu0 %1485 }
 0x327   :  { %v1498_v6 = vsub.f32 %v1466_v41, %v1491_v24  ;;  %1758 = vlog2.f32 %v1486_v0 }
 0x329   :  { %1502 = vst.msk [vmem:[#allocation2] sm:$0xff] %vm1453_vm11, %v1498_v6 }
 0x32a   :  { %v1489_v48 = vpop.xlane.xlu1 %1488 }
 0x32b   :  { %1760 = vlog2.f32 %v1489_v48 }
 0x334   :  { %v1759_v27 = vpop.eup %1758 }
 0x335   :  { %v1495_v14 = vmul.f32 0.6931472, %v1759_v27 }
 0x337   :  { %v1500_v52 = vsub.f32 %v1468_v2, %v1495_v14 }
 0x338   :  { %v1761_v15 = vpop.eup %1760 }
 0x339   :  { %1504 = vst.msk [vmem:[#allocation2 + $0x10] sm:$0xff] %vm1453_vm11, %v1500_v52  ;;  %v1497_v9 = vmul.f32 0.6931472, %v1761_v15 }
 0x33b   :  { %v1501_v19 = vsub.f32 %v1469_v21, %v1497_v9 }
 0x33d   :  { %1505 = vst.msk [vmem:[#allocation2 + $0x18] sm:$0xff] %vm1453_vm11, %v1501_v19 }
 0x33e   :  { %1773 = shalt.err (!%p1770_p4)
}
 0x33f   :  { %s1787_s28 = smov 128   ;;  %s1788_s29 = smov 8  }
 0x340   :  { %1517 = dma.vmem_to_hbm [thread:$0]  %s1512_s26, 512, %s2559_s4, [#allocation3], %s1787_s28, %s1787_s28, %s1788_s29  }
 0x341   :  { %1782 = dma.done.wait [#allocation3], 512  }
 0x342   :  { %1783 = vsyncadd [#allocation3], 4294966784 }
 0x343   :  { %1521 = vsyncpa [#allocation3], 1 }

</bundles_post_ra>
